<compile_context>
chip_gen: v7x
topology: tpu7x:2x2x1
jax: 0.10.0
libtpu: 0.0.40
codegen_flags: <defaults>
</compile_context>

<pallas_src>
import math

import jax
import jax.numpy as jnp
from jax import lax
from jax.experimental import pallas as pl
from jax.experimental.pallas import tpu as pltpu

LANE = 128


def _round_up(n, m):
    return ((n + m - 1) // m) * m


def _make_kernel(layer_meta, Bt, L):
    """layer_meta: tuple of ('packed', cin) or ('wide', cin) per k=3 conv."""
    rows = Bt * L
    num_layers = len(layer_meta)

    def kernel(x_ref, *refs):
        o_ref = refs[-1]
        params = refs[:-1]
        Ep = x_ref.shape[-1]
        h = x_ref[...].reshape(rows, Ep).astype(jnp.float32)      # (rows, Ep)

        # Sequence-boundary masks: (rows, 1), hoisted out of the layer loop.
        seq_pos = lax.broadcasted_iota(jnp.int32, (rows, 1), 0) % L
        is_first = seq_pos == 0          # no x[l-1] contribution at l == 0
        is_last = seq_pos == (L - 1)     # no x[l+1] contribution at l == L-1

        for i, (mode, cin) in enumerate(layer_meta):
            w_ref = params[2 * i]        # bf16 weight (packed or 3-stack)
            b = params[2 * i + 1][...]   # (1, Cout_p) f32
            # Shift rows with positive roll amounts only; zero the rows that
            # wrapped across a sequence/batch boundary (masks broadcast).
            x_prev = jnp.where(is_first, 0.0, pltpu.roll(h, shift=1, axis=0))
            x_next = jnp.where(is_last, 0.0,
                               pltpu.roll(h, shift=rows - 1, axis=0))
            if mode == "packed":
                # Lanes >= cin of h / x_prev / x_next are guaranteed zero, so
                # two lane-rolls + adds build the tap-concatenated row inside
                # one 128-lane vreg row (contraction dim stays 128).
                h3 = (x_prev
                      + pltpu.roll(h, shift=cin, axis=1)
                      + pltpu.roll(x_next, shift=2 * cin, axis=1))
                acc = jnp.dot(h3.astype(jnp.bfloat16), w_ref[...],
                              preferred_element_type=jnp.float32)
            else:
                # Wide path: three accumulating dots, no concat materialized.
                acc = jnp.dot(x_prev.astype(jnp.bfloat16), w_ref[0],
                              preferred_element_type=jnp.float32)
                acc = acc + jnp.dot(h.astype(jnp.bfloat16), w_ref[1],
                                    preferred_element_type=jnp.float32)
                acc = acc + jnp.dot(x_next.astype(jnp.bfloat16), w_ref[2],
                                    preferred_element_type=jnp.float32)
            h = jnp.maximum(acc + b, 0.0)
            # Dropout(p): identity in eval mode.
            # TODO(synk): training-mode dropout not implemented.

        wf = params[2 * num_layers][...]      # (Cc_p, Ep_out) bf16, k=1 conv
        bf = params[2 * num_layers + 1][...]  # (1, Ep_out) f32
        out = jnp.dot(h.astype(jnp.bfloat16), wf,
                      preferred_element_type=jnp.float32) + bf
        o_ref[...] = out.reshape(Bt, L, o_ref.shape[-1]).astype(o_ref.dtype)

    return kernel


def _const_spec(p):
    nd = p.ndim
    return pl.BlockSpec(p.shape, lambda b, _nd=nd: (0,) * _nd)


def _choose_num_batch_blocks(B, L, Ep, target_block_bytes=4 << 20, min_steps=4):
    """>=4 grid steps (pipelining + both v7x TCs busy) with <=~4 MiB blocks."""
    divisors = [d for d in range(1, B + 1) if B % d == 0]
    for nb in divisors:
        if nb >= min_steps and (B // nb) * L * Ep * 4 <= target_block_bytes:
            return nb
    for nb in divisors:                       # at least fit the byte budget
        if (B // nb) * L * Ep * 4 <= target_block_bytes:
            return nb
    return B


def cnn_encoder_pallas(x, params, layer_meta, num_batch_blocks=None):
    """x: (B, L, E) float32. params: lane-padded kernel-layout params (bf16
    weights, f32 biases) from init_params. layer_meta: per-layer packing info.

    num_batch_blocks (grid steps along batch): auto-chosen to give >= 4 steps
    and <= ~4 MiB input blocks when B allows — this keeps blocks well under
    v7x's 64 MiB VMEM and gives each TensorCore multiple steps, while on
    v5e/v6e it overlaps HBM DMA with the matmuls.
    """
    B, L, E = x.shape
    Ep_in = _round_up(E, LANE)
    Ep_out = params[-1].shape[-1]            # lane-padded embedding dim

    if num_batch_blocks is None:
        num_batch_blocks = _choose_num_batch_blocks(B, L, Ep_in)
    assert B % num_batch_blocks == 0
    Bt = B // num_batch_blocks

    if Ep_in != E:
        x = jnp.pad(x, ((0, 0), (0, 0), (0, Ep_in - E)))

    kernel = _make_kernel(layer_meta, Bt, L)
    in_specs = [pl.BlockSpec((Bt, L, Ep_in), lambda b: (b, 0, 0))]
    in_specs += [_const_spec(p) for p in params]

    # Cost estimate (advisory for XLA scheduling around the custom call).
    rows_total = B * L
    flops = 0
    for i in range(len(layer_meta)):
        ws = params[2 * i].shape
        k_dim = ws[-2] * (ws[0] if len(ws) == 3 else 1)
        flops += 2 * rows_total * k_dim * ws[-1]
    flops += 2 * rows_total * params[-2].shape[0] * params[-2].shape[1]
    param_bytes = sum(int(p.size) * p.dtype.itemsize for p in params)
    bytes_accessed = (int(x.size) * 4 + B * L * Ep_out * 4 + param_bytes)

    # VMEM budget: double-buffered input/output blocks + params + live set.
    in_block = Bt * L * Ep_in * 4
    out_block = Bt * L * Ep_out * 4
    max_lane = max(Ep_in, Ep_out, max(p.shape[-1] for p in params))
    live = Bt * L * max_lane * 4 * 8
    vmem_limit = int(min(max(2 * (in_block + out_block) + 2 * param_bytes
                             + live + (4 << 20), 16 << 20), 64 << 20))

    out = pl.pallas_call(
        kernel,
        out_shape=jax.ShapeDtypeStruct((B, L, Ep_out), x.dtype),
        grid=(num_batch_blocks,),
        in_specs=in_specs,
        out_specs=pl.BlockSpec((Bt, L, Ep_out), lambda b: (b, 0, 0)),
        compiler_params=pltpu.CompilerParams(
            dimension_semantics=("parallel",),
            vmem_limit_bytes=vmem_limit),
        cost_estimate=pl.CostEstimate(flops=flops, transcendentals=0,
                                      bytes_accessed=bytes_accessed),
    )(x, *params)
    return out[:, :, :E]


def init_params(key, embedding_dim, conv_channels, kernel_size, num_layers):
    """Deterministic init mirroring nn.Conv1d default (uniform +/- 1/sqrt(fan_in)).

    Returns (torch_layout_params, kernel_layout_params, layer_meta).
      torch layout : weight (Cout, Cin, K), bias (Cout,)  -- for the reference.
      kernel layout: k=3 conv -> either a packed (Cin_p, Cout_p) bf16 weight
                     (taps in lanes [0,3*Cin)) or a (3, Cin_p, Cout_p) bf16
                     stack, plus (1, Cout_p) f32 bias; final k=1 conv ->
                     (Cc_p, E_p) bf16 weight and (1, E_p) f32 bias.
    """
    assert kernel_size == 3, "kernel assumes kernel_size=3, padding=1"
    torch_params, kernel_params, layer_meta = [], [], []
    in_ch = embedding_dim
    keys = jax.random.split(key, num_layers + 1)

    def one_conv(k, cin, cout, ksize):
        bound = 1.0 / math.sqrt(cin * ksize)
        kw, kb = jax.random.split(k)
        w = jax.random.uniform(kw, (cout, cin, ksize), jnp.float32, -bound, bound)
        b = jax.random.uniform(kb, (cout,), jnp.float32, -bound, bound)
        return w, b

    for i in range(num_layers):
        w, b = one_conv(keys[i], in_ch, conv_channels, kernel_size)
        torch_params.append((w, b))
        cin_p = _round_up(in_ch, LANE)
        cout_p = _round_up(conv_channels, LANE)
        # out[l] = x[l-1] @ W0 + x[l] @ W1 + x[l+1] @ W2, with W_k = w[:, :, k].T
        if 3 * in_ch <= cin_p:
            wp = jnp.zeros((cin_p, cout_p), jnp.float32)
            for k in range(kernel_size):
                wp = wp.at[k * in_ch:(k + 1) * in_ch, :conv_channels].set(
                    w[:, :, k].T)
            kernel_params.append(wp.astype(jnp.bfloat16))
            layer_meta.append(("packed", in_ch))
        else:
            wt = jnp.stack([
                jnp.pad(w[:, :, k].T,
                        ((0, cin_p - in_ch), (0, cout_p - conv_channels)))
                for k in range(kernel_size)])
            kernel_params.append(wt.astype(jnp.bfloat16))
            layer_meta.append(("wide", in_ch))
        kernel_params.append(
            jnp.pad(b, (0, cout_p - conv_channels)).reshape(1, -1))
        in_ch = conv_channels

    wf, bf = one_conv(keys[-1], conv_channels, embedding_dim, 1)
    torch_params.append((wf, bf))
    cc_p = _round_up(conv_channels, LANE)
    e_p = _round_up(embedding_dim, LANE)
    kernel_params.append(
        jnp.pad(wf[:, :, 0].T,
                ((0, cc_p - conv_channels), (0, e_p - embedding_dim))
                ).astype(jnp.bfloat16))
    kernel_params.append(
        jnp.pad(bf, (0, e_p - embedding_dim)).reshape(1, -1))
    return torch_params, kernel_params, tuple(layer_meta)


def cnn_encoder_ref(x, torch_params, kernel_size):
    """Pure-JAX f32 reference reproducing the PyTorch forward (eval mode)."""
    h = jnp.transpose(x, (0, 2, 1))  # (B, E, L) == x.permute(0, 2, 1)
    n = len(torch_params)
    for i, (w, b) in enumerate(torch_params):
        is_last = i == n - 1
        pad = 0 if is_last else 1
        h = lax.conv_general_dilated(
            h, w, window_strides=(1,), padding=[(pad, pad)],
            dimension_numbers=("NCW", "OIW", "NCW"))
        h = h + b[None, :, None]
        if not is_last:
            h = jnp.maximum(h, 0.0)
    return jnp.transpose(h, (0, 2, 1))  # back to (B, L, E)


if __name__ == "__main__":
    # config: {'num_layers': 2, 'conv_channels': 32, 'kernel_size': 3, 'dropout': 0.1}
    embedding_dim = 32
    num_layers = 2
    conv_channels = 32
    kernel_size = 3

    B, L = 8, 16   # small; B=8 lets the auto-chooser pick 4 pipelined grid steps
    key = jax.random.PRNGKey(0)
    kx, kp = jax.random.split(key)
    x = jax.random.normal(kx, (B, L, embedding_dim), jnp.float32)

    torch_params, kernel_params, layer_meta = init_params(
        kp, embedding_dim, conv_channels, kernel_size, num_layers)

    out = cnn_encoder_pallas(x, kernel_params, layer_meta)
    out = jax.block_until_ready(out)

    ref = cnn_encoder_ref(x, torch_params, kernel_size)
    assert out.shape == (B, L, embedding_dim)
    # bf16 MXU matmuls vs f32 reference -> loosened tolerance.
    max_err = float(jnp.max(jnp.abs(out - ref)))
    assert jnp.allclose(out, ref, atol=5e-2, rtol=5e-2), (
        f"mismatch vs reference (max abs err {max_err})")

    print("KERNEL_OK")
</pallas_src>

<mosaic_0001>
module attributes {stable_mosaic.version = 11 : i64} {
  func.func @kernel(%arg0: i32, %arg1: memref<2x16x128xf32, #tpu.memory_space<vmem>>, %arg2: memref<128x128xbf16, #tpu.memory_space<vmem>>, %arg3: memref<1x128xf32, #tpu.memory_space<vmem>>, %arg4: memref<128x128xbf16, #tpu.memory_space<vmem>>, %arg5: memref<1x128xf32, #tpu.memory_space<vmem>>, %arg6: memref<128x128xbf16, #tpu.memory_space<vmem>>, %arg7: memref<1x128xf32, #tpu.memory_space<vmem>>, %arg8: memref<2x16x128xf32, #tpu.memory_space<vmem>>) attributes {dimension_semantics = [#tpu.dimension_semantics<parallel>], iteration_bounds = array<i64: 4>, scalar_prefetch = 0 : i64, scratch_operands = 0 : i64, tpu.core_type = #tpu.core_type<tc>, window_params = [{transform_indices = @transform_0, window_bounds = array<i64: 2, 16, 128>}, {pipeline_mode = #tpu.pipeline_mode<synchronous>, transform_indices = @transform_1, window_bounds = array<i64: 128, 128>}, {pipeline_mode = #tpu.pipeline_mode<synchronous>, transform_indices = @transform_2, window_bounds = array<i64: 1, 128>}, {pipeline_mode = #tpu.pipeline_mode<synchronous>, transform_indices = @transform_3, window_bounds = array<i64: 128, 128>}, {pipeline_mode = #tpu.pipeline_mode<synchronous>, transform_indices = @transform_4, window_bounds = array<i64: 1, 128>}, {pipeline_mode = #tpu.pipeline_mode<synchronous>, transform_indices = @transform_5, window_bounds = array<i64: 128, 128>}, {pipeline_mode = #tpu.pipeline_mode<synchronous>, transform_indices = @transform_6, window_bounds = array<i64: 1, 128>}, {transform_indices = @transform_7, window_bounds = array<i64: 2, 16, 128>}]} {
    %c0 = arith.constant 0 : index
    %c0_0 = arith.constant 0 : index
    %c0_1 = arith.constant 0 : index
    %0 = vector.load %arg1[%c0, %c0_0, %c0_1] : memref<2x16x128xf32, #tpu.memory_space<vmem>>, vector<2x16x128xf32>
    %1 = vector.shape_cast %0 : vector<2x16x128xf32> to vector<32x128xf32>
    %2 = tpu.iota {dimensions = array<i32: 0>} : vector<32x1xi32>
    %c16_i32 = arith.constant 16 : i32
    %c0_i32 = arith.constant 0 : i32
    %3 = arith.cmpi eq, %c16_i32, %c0_i32 : i32
    %c1_i32 = arith.constant 1 : i32
    %4 = arith.select %3, %c1_i32, %c16_i32 : i32
    %5 = vector.broadcast %4 : i32 to vector<32x1xi32>
    %6 = arith.remsi %2, %5 : vector<32x1xi32>
    %c0_i32_2 = arith.constant 0 : i32
    %7 = vector.broadcast %c0_i32_2 : i32 to vector<32x1xi32>
    %8 = arith.cmpi ne, %6, %7 : vector<32x1xi32>
    %c0_i32_3 = arith.constant 0 : i32
    %9 = vector.broadcast %c0_i32_3 : i32 to vector<32x1xi32>
    %10 = arith.cmpi slt, %6, %9 : vector<32x1xi32>
    %c0_i32_4 = arith.constant 0 : i32
    %11 = arith.cmpi slt, %4, %c0_i32_4 : i32
    %12 = vector.broadcast %11 : i1 to vector<32x1xi1>
    %13 = vector.broadcast %12 : vector<32x1xi1> to vector<32x1xi1>
    %14 = arith.xori %10, %13 : vector<32x1xi1>
    %15 = arith.andi %14, %8 : vector<32x1xi1>
    %16 = vector.broadcast %4 : i32 to vector<32x1xi32>
    %17 = arith.addi %6, %16 : vector<32x1xi32>
    %18 = arith.select %15, %17, %6 : vector<32x1xi1>, vector<32x1xi32>
    %c0_i32_5 = arith.constant 0 : i32
    %19 = vector.broadcast %c0_i32_5 : i32 to vector<32x1xi32>
    %20 = arith.cmpi eq, %18, %19 : vector<32x1xi32>
    %c15_i32 = arith.constant 15 : i32
    %21 = vector.broadcast %c15_i32 : i32 to vector<32x1xi32>
    %22 = arith.cmpi eq, %18, %21 : vector<32x1xi32>
    %c0_6 = arith.constant 0 : index
    %c0_7 = arith.constant 0 : index
    %23 = vector.load %arg3[%c0_6, %c0_7] : memref<1x128xf32, #tpu.memory_space<vmem>>, vector<1x128xf32>
    %c1_i32_8 = arith.constant 1 : i32
    %24 = tpu.dynamic_rotate %1 by %c1_i32_8 dim 0 : vector<32x128xf32>, i32 -> vector<32x128xf32>
    %cst = arith.constant 0.000000e+00 : f32
    %25 = vector.shape_cast %20 : vector<32x1xi1> to vector<32x1xi1>
    %26 = vector.broadcast %25 : vector<32x1xi1> to vector<32x128xi1>
    %27 = vector.broadcast %cst : f32 to vector<32x128xf32>
    %28 = arith.select %26, %27, %24 : vector<32x128xi1>, vector<32x128xf32>
    %c31_i32 = arith.constant 31 : i32
    %29 = tpu.dynamic_rotate %1 by %c31_i32 dim 0 : vector<32x128xf32>, i32 -> vector<32x128xf32>
    %cst_9 = arith.constant 0.000000e+00 : f32
    %30 = vector.shape_cast %22 : vector<32x1xi1> to vector<32x1xi1>
    %31 = vector.broadcast %30 : vector<32x1xi1> to vector<32x128xi1>
    %32 = vector.broadcast %cst_9 : f32 to vector<32x128xf32>
    %33 = arith.select %31, %32, %29 : vector<32x128xi1>, vector<32x128xf32>
    %c32_i32 = arith.constant 32 : i32
    %34 = tpu.dynamic_rotate %1 by %c32_i32 dim 1 : vector<32x128xf32>, i32 -> vector<32x128xf32>
    %35 = arith.addf %28, %34 : vector<32x128xf32>
    %c64_i32 = arith.constant 64 : i32
    %36 = tpu.dynamic_rotate %33 by %c64_i32 dim 1 : vector<32x128xf32>, i32 -> vector<32x128xf32>
    %37 = arith.addf %35, %36 : vector<32x128xf32>
    %38 = arith.truncf %37 : vector<32x128xf32> to vector<32x128xbf16>
    %c0_10 = arith.constant 0 : index
    %c0_11 = arith.constant 0 : index
    %39 = vector.load %arg2[%c0_10, %c0_11] : memref<128x128xbf16, #tpu.memory_space<vmem>>, vector<128x128xbf16>
    %cst_12 = arith.constant dense<0.000000e+00> : vector<32x128xf32>
    %40 = tpu.matmul %38, %39, %cst_12 {dimension_numbers = #tpu.dot_dimension_numbers<[1], [0], [0], [1], [0, 0, 1, 1], [], []>} : vector<32x128xbf16>, vector<128x128xbf16>, vector<32x128xf32> -> vector<32x128xf32>
    %41 = vector.broadcast %23 : vector<1x128xf32> to vector<32x128xf32>
    %42 = arith.addf %40, %41 : vector<32x128xf32>
    %cst_13 = arith.constant 0.000000e+00 : f32
    %43 = vector.broadcast %cst_13 : f32 to vector<32x128xf32>
    %44 = arith.maximumf %42, %43 : vector<32x128xf32>
    %c0_14 = arith.constant 0 : index
    %c0_15 = arith.constant 0 : index
    %45 = vector.load %arg5[%c0_14, %c0_15] : memref<1x128xf32, #tpu.memory_space<vmem>>, vector<1x128xf32>
    %c1_i32_16 = arith.constant 1 : i32
    %46 = tpu.dynamic_rotate %44 by %c1_i32_16 dim 0 : vector<32x128xf32>, i32 -> vector<32x128xf32>
    %cst_17 = arith.constant 0.000000e+00 : f32
    %47 = vector.shape_cast %20 : vector<32x1xi1> to vector<32x1xi1>
    %48 = vector.broadcast %47 : vector<32x1xi1> to vector<32x128xi1>
    %49 = vector.broadcast %cst_17 : f32 to vector<32x128xf32>
    %50 = arith.select %48, %49, %46 : vector<32x128xi1>, vector<32x128xf32>
    %c31_i32_18 = arith.constant 31 : i32
    %51 = tpu.dynamic_rotate %44 by %c31_i32_18 dim 0 : vector<32x128xf32>, i32 -> vector<32x128xf32>
    %cst_19 = arith.constant 0.000000e+00 : f32
    %52 = vector.shape_cast %22 : vector<32x1xi1> to vector<32x1xi1>
    %53 = vector.broadcast %52 : vector<32x1xi1> to vector<32x128xi1>
    %54 = vector.broadcast %cst_19 : f32 to vector<32x128xf32>
    %55 = arith.select %53, %54, %51 : vector<32x128xi1>, vector<32x128xf32>
    %c32_i32_20 = arith.constant 32 : i32
    %56 = tpu.dynamic_rotate %44 by %c32_i32_20 dim 1 : vector<32x128xf32>, i32 -> vector<32x128xf32>
    %57 = arith.addf %50, %56 : vector<32x128xf32>
    %c64_i32_21 = arith.constant 64 : i32
    %58 = tpu.dynamic_rotate %55 by %c64_i32_21 dim 1 : vector<32x128xf32>, i32 -> vector<32x128xf32>
    %59 = arith.addf %57, %58 : vector<32x128xf32>
    %60 = arith.truncf %59 : vector<32x128xf32> to vector<32x128xbf16>
    %c0_22 = arith.constant 0 : index
    %c0_23 = arith.constant 0 : index
    %61 = vector.load %arg4[%c0_22, %c0_23] : memref<128x128xbf16, #tpu.memory_space<vmem>>, vector<128x128xbf16>
    %cst_24 = arith.constant dense<0.000000e+00> : vector<32x128xf32>
    %62 = tpu.matmul %60, %61, %cst_24 {dimension_numbers = #tpu.dot_dimension_numbers<[1], [0], [0], [1], [0, 0, 1, 1], [], []>} : vector<32x128xbf16>, vector<128x128xbf16>, vector<32x128xf32> -> vector<32x128xf32>
    %63 = vector.broadcast %45 : vector<1x128xf32> to vector<32x128xf32>
    %64 = arith.addf %62, %63 : vector<32x128xf32>
    %cst_25 = arith.constant 0.000000e+00 : f32
    %65 = vector.broadcast %cst_25 : f32 to vector<32x128xf32>
    %66 = arith.maximumf %64, %65 : vector<32x128xf32>
    %c0_26 = arith.constant 0 : index
    %c0_27 = arith.constant 0 : index
    %67 = vector.load %arg6[%c0_26, %c0_27] : memref<128x128xbf16, #tpu.memory_space<vmem>>, vector<128x128xbf16>
    %c0_28 = arith.constant 0 : index
    %c0_29 = arith.constant 0 : index
    %68 = vector.load %arg7[%c0_28, %c0_29] : memref<1x128xf32, #tpu.memory_space<vmem>>, vector<1x128xf32>
    %69 = arith.truncf %66 : vector<32x128xf32> to vector<32x128xbf16>
    %cst_30 = arith.constant dense<0.000000e+00> : vector<32x128xf32>
    %70 = tpu.matmul %69, %67, %cst_30 {dimension_numbers = #tpu.dot_dimension_numbers<[1], [0], [0], [1], [0, 0, 1, 1], [], []>} : vector<32x128xbf16>, vector<128x128xbf16>, vector<32x128xf32> -> vector<32x128xf32>
    %71 = vector.broadcast %68 : vector<1x128xf32> to vector<32x128xf32>
    %72 = arith.addf %70, %71 : vector<32x128xf32>
    %73 = vector.shape_cast %72 : vector<32x128xf32> to vector<2x16x128xf32>
    %c0_31 = arith.constant 0 : index
    %c0_32 = arith.constant 0 : index
    %c0_33 = arith.constant 0 : index
    %74 = vector.load %arg8[%c0_31, %c0_32, %c0_33] : memref<2x16x128xf32, #tpu.memory_space<vmem>>, vector<2x16x128xf32>
    tpu.vector_store %arg8[%c0_31, %c0_32, %c0_33], %73 {strides = array<i32>} : memref<2x16x128xf32, #tpu.memory_space<vmem>>, vector<2x16x128xf32>,
    return
  }
  func.func @transform_0(%arg0: i32) -> (i32, i32, i32) {
    %c0_i32 = arith.constant 0 : i32
    %c0_i32_0 = arith.constant 0 : i32
    %c0_i32_1 = arith.constant 0 : i32
    return %arg0, %c0_i32, %c0_i32_0 : i32, i32, i32
  }
  func.func @transform_1(%arg0: i32) -> (i32, i32) {
    %c0_i32 = arith.constant 0 : i32
    %c0_i32_0 = arith.constant 0 : i32
    %c0_i32_1 = arith.constant 0 : i32
    return %c0_i32, %c0_i32_0 : i32, i32
  }
  func.func @transform_2(%arg0: i32) -> (i32, i32) {
    %c0_i32 = arith.constant 0 : i32
    %c0_i32_0 = arith.constant 0 : i32
    %c0_i32_1 = arith.constant 0 : i32
    return %c0_i32, %c0_i32_0 : i32, i32
  }
  func.func @transform_3(%arg0: i32) -> (i32, i32) {
    %c0_i32 = arith.constant 0 : i32
    %c0_i32_0 = arith.constant 0 : i32
    %c0_i32_1 = arith.constant 0 : i32
    return %c0_i32, %c0_i32_0 : i32, i32
  }
  func.func @transform_4(%arg0: i32) -> (i32, i32) {
    %c0_i32 = arith.constant 0 : i32
    %c0_i32_0 = arith.constant 0 : i32
    %c0_i32_1 = arith.constant 0 : i32
    return %c0_i32, %c0_i32_0 : i32, i32
  }
  func.func @transform_5(%arg0: i32) -> (i32, i32) {
    %c0_i32 = arith.constant 0 : i32
    %c0_i32_0 = arith.constant 0 : i32
    %c0_i32_1 = arith.constant 0 : i32
    return %c0_i32, %c0_i32_0 : i32, i32
  }
  func.func @transform_6(%arg0: i32) -> (i32, i32) {
    %c0_i32 = arith.constant 0 : i32
    %c0_i32_0 = arith.constant 0 : i32
    %c0_i32_1 = arith.constant 0 : i32
    return %c0_i32, %c0_i32_0 : i32, i32
  }
  func.func @transform_7(%arg0: i32) -> (i32, i32, i32) {
    %c0_i32 = arith.constant 0 : i32
    %c0_i32_0 = arith.constant 0 : i32
    %c0_i32_1 = arith.constant 0 : i32
    return %arg0, %c0_i32, %c0_i32_0 : i32, i32, i32
  }
}

</mosaic_0001>

<bundles_post_ra>
// kernel: tpu_custom_call.1
= control target key start
LH: loop header
LB: loop body
LE: loop exit
PB: predicated region body
PF: predicated region fallthrough
CT: control target
= control target key end

     0   :  { %12 = vsyncpa [#allocation3], 0  ;;  %s1881_s0 = inlined_call_operand.hbm [shape: f32[8,16,128], index: 0, kind: input, shape index: {}]   ;;  %s1882_s1 = inlined_call_operand.hbm [shape: bf16[128,128], index: 1, kind: input, shape index: {}]   ;;  %s1883_s2 = inlined_call_operand.vmem [shape: f32[1,128], index: 2, kind: input, shape index: {}]   ;;  %s1884_s3 = inlined_call_operand.hbm [shape: bf16[128,128], index: 3, kind: input, shape index: {}]   ;;  %s1885_s4 = inlined_call_operand.vmem [shape: f32[1,128], index: 4, kind: input, shape index: {}]   ;;  %s1886_s5 = inlined_call_operand.hbm [shape: bf16[128,128], index: 5, kind: input, shape index: {}]   ;;  %s1887_s6 = inlined_call_operand.vmem [shape: f32[1,128], index: 6, kind: input, shape index: {}]   ;;  %s1888_s7 = inlined_call_operand.hbm [shape: f32[8,16,128], index: 7, kind: output, shape index: {}]  }
   0x1   :  { %14 = vsyncpa [#allocation3 + $0x1], 0 }
   0x2   :  { %15 = vsyncpa [#allocation6], 0 }
   0x3   :  { %16 = vsyncpa [#allocation9], 0 }
   0x4   :  { %17 = vsyncpa [#allocation4], 0 }
   0x5   :  { %19 = vsyncpa [#allocation4 + $0x1], 0  ;;  %s1514_s24 = smov 0   ;;  %s1516_s25 = smov 0  }
   0x6   :  { %s1518_s26 = smov 0   ;;  %s1520_s27 = smov 0  }
   0x7 LB: > { %s1535_s28 = sadd.s32 4294967295, %s1459_s27   ;;  %s1019_s29 = sadd.s32 4294967294, %s1459_s27   ;;  %s1459_s27 = sphi %s1520_s27, %s1921_s27   ;;  %s1455_s26 = sphi %s1518_s26, %s1920_s26   ;;  %s1451_s25 = sphi %s1516_s25, %s1919_s25   ;;  %s1447_s24 = sphi %s1514_s24, %s1918_s24  }
   0x8   : > { %p45_p0 = scmp.ne.s32.totalorder %s1451_s25, %s1447_s24  ;;  %p1889_p1 = scmp.eq.s32.totalorder %s1535_s28, 0 }
   0x9   : > { %p201_p3 = scmp.eq.s32.totalorder %s1019_s29, 3  ;;  %p1020_p5 = scmp.ge.s32.totalorder %s1459_s27, 1 }
   0xa   : > { %p1544_p4 = por %p1889_p1, %p45_p0  ;;  %p208_p7 = scmp.lt.s32.totalorder %s1459_s27, 5 }
   0xb   : > { %p1549_p6 = por %p201_p3, %p45_p0  ;;  %s1461_s10 = smov [#allocation5]  }
   0xc   : > { %s1893_s30 = scalar_select %p1544_p4, 1, 0 }
   0xd   : > { %s1894_s8 = scalar_select %p1549_p6, 1, 0 }
   0xe   : > { %p1554_p8 = pnand %p1020_p5, %p208_p7  ;;  %s220_s11 = sshll.u32 %s1461_s10, 4  ;;  %s1558_s11 = int_to_ptr.vmem [resolvable:$true] %s220_s11 }
   0xf   : > { %1895 = sst [smem:[#allocation15_spill]] %s1894_s8  ;;  %s1462_s13 = smov [#allocation7]  }
  0x10   : > { %s1896_s9 = scalar_select %p1554_p8, 1, 0 }
  0x11   : > { %p1178_p9 = pneg %p1554_p8  ;;  %s236_s14 = sshll.u32 %s1462_s13, 4  ;;  %s1568_s14 = int_to_ptr.vmem [resolvable:$true] %s236_s14 }
  0x12   : > { %s1463_s15 = smov [#allocation8]   ;;  %s1271_s19 = scalar_lea.hbm %s1882_s1, 1024 }
  0x13   : > { %p1564_p10 = pnand %p1178_p9, %p1889_p1  ;;  %s1570_s16 = sshll.u32 %s1463_s15, 4  ;;  %s253_s16 = int_to_ptr.vmem [resolvable:$true] %s1570_s16 }
  0x14   : > { %p1272_p11 = scmp.ne.s32.totalorder %s1882_s1, %s1271_s19  ;;  %p1278_p3 = scmp.lt.u32.totalorder %s1271_s19, %s1882_s1 }
  0x15   : > { %p1580_p12 = pneg %p1564_p10 }
  0x17   : > { %p1274_p13 = pnand %p1580_p12, %p1272_p11 }
  0x19   : > { %p1275_p0 = pneg %p1274_p13 }
  0x1b   : > { %p1280_p5 = pnand %p1278_p3, %p1275_p0 }
  0x1d   : > { %1283 = shalt.err (!%p1280_p5)
}
  0x1e   : > { %s1284_s10 = scalar_lea.vmem %s1558_s11, 1024  ;;  %p1292_p2 = scmp.lt.s32.totalorder %s1558_s11, %s1558_s11 }
  0x1f   : > { %p1285_p7 = scmp.ne.s32.totalorder %s1558_s11, %s1284_s10  ;;  %p1293_p6 = scmp.lt.s32.totalorder %s1284_s10, %s1284_s10 }
  0x21   : > { %p1287_p9 = pnand %p1285_p7, %p1580_p12  ;;  %p1294_p11 = por %p1293_p6, %p1292_p2 }
  0x23   : > { %p1288_p1 = pneg %p1287_p9 }
  0x25   : > { %p1295_p13 = pnand %p1294_p11, %p1288_p1 }
  0x27   : > { %1298 = shalt.err (!%p1295_p13)
}
  0x28   : > { %s1464_s13 = smov 64   ;;  %s1465_s15 = smov 4  }
  0x29   : > { %1181 = dma.hbm_to_vmem [thread:$0]  (!%p1564_p10), %s1882_s1, 1024, %s1558_s11, [#allocation6], %s1464_s13, %s1464_s13, %s1465_s15  }
  0x2a   : > { %s1299_s21 = scalar_lea.hbm %s1884_s3, 1024 }
  0x2b   : > { %p1300_p1 = scmp.ne.s32.totalorder %s1884_s3, %s1299_s21  ;;  %p1306_p0 = scmp.lt.u32.totalorder %s1299_s21, %s1884_s3 }
  0x2d   : > { %p1302_p2 = pnand %p1300_p1, %p1580_p12 }
  0x2f   : > { %p1303_p6 = pneg %p1302_p2 }
  0x31   : > { %p1308_p3 = pnand %p1306_p0, %p1303_p6 }
  0x33   : > { %1311 = shalt.err (!%p1308_p3)
}
  0x34   : > { %s1312_s11 = scalar_lea.vmem %s1568_s14, 1024  ;;  %p1320_p11 = scmp.lt.s32.totalorder %s1568_s14, %s1568_s14 }
  0x35   : > { %p1313_p5 = scmp.ne.s32.totalorder %s1568_s14, %s1312_s11  ;;  %p1321_p13 = scmp.lt.s32.totalorder %s1312_s11, %s1312_s11 }
  0x37   : > { %p1315_p7 = pnand %p1313_p5, %p1580_p12  ;;  %p1322_p1 = por %p1321_p13, %p1320_p11 }
  0x39   : > { %p1316_p9 = pneg %p1315_p7 }
  0x3b   : > { %p1323_p2 = pnand %p1322_p1, %p1316_p9 }
  0x3d   : > { %1326 = shalt.err (!%p1323_p2)
}
  0x3e   : > { %1184 = dma.hbm_to_vmem [thread:$0]  (!%p1564_p10), %s1884_s3, 1024, %s1568_s14, [#allocation6], %s1464_s13, %s1464_s13, %s1465_s15  }
  0x3f   : > { %s1327_s20 = scalar_lea.hbm %s1886_s5, 1024 }
  0x40   : > { %p1328_p6 = scmp.ne.s32.totalorder %s1886_s5, %s1327_s20  ;;  %p1334_p5 = scmp.lt.u32.totalorder %s1327_s20, %s1886_s5 }
  0x42   : > { %p1330_p0 = pnand %p1328_p6, %p1580_p12 }
  0x44   : > { %p1331_p3 = pneg %p1330_p0 }
  0x46   : > { %p1336_p7 = pnand %p1334_p5, %p1331_p3 }
  0x48   : > { %1339 = shalt.err (!%p1336_p7)
}
  0x49   : > { %s1340_s11 = scalar_lea.vmem %s253_s16, 1024  ;;  %p1348_p1 = scmp.lt.s32.totalorder %s253_s16, %s253_s16 }
  0x4a   : > { %p1341_p9 = scmp.ne.s32.totalorder %s253_s16, %s1340_s11  ;;  %p1349_p2 = scmp.lt.s32.totalorder %s1340_s11, %s1340_s11 }
  0x4c   : > { %p1343_p11 = pnand %p1341_p9, %p1580_p12  ;;  %p1350_p4 = por %p1349_p2, %p1348_p1 }
  0x4e   : > { %p1344_p13 = pneg %p1343_p11 }
  0x50   : > { %p1351_p8 = pnand %p1350_p4, %p1344_p13 }
  0x52   : > { %1354 = shalt.err (!%p1351_p8)
}
  0x53   : > { %1187 = dma.hbm_to_vmem [thread:$0]  (!%p1564_p10), %s1886_s5, 1024, %s253_s16, [#allocation9], %s1464_s13, %s1464_s13, %s1465_s15  }
  0x54   : > { %s1653_s22 = sadd.s32 1, %s1459_s27   ;;  %s32_s17 = sadd.s32 1, %s1455_s26 }
  0x55   : > { %s29_s12 = ssub.s32 %s1459_s27, %s1653_s22  ;;  %p39_p8 = scmp.ne.s32.totalorder %s1455_s26, %s1451_s25 }
  0x56   : > { %p30_p4 = scmp.eq.s32.totalorder %s29_s12, 0  ;;  %p40_p12 = scmp.eq.s32.totalorder %s1459_s27, 0 }
  0x57   : > { %p1199_p6 = scmp.lt.s32.totalorder %s1459_s27, 4  ;;  %p1899_p3 = scmp.eq.s32.totalorder %s1535_s28, 3 }
  0x58   : > { %s1663_s18 = scalar_select %p30_p4, %s1455_s26, %s32_s17  }
  0x59   : > { %p41_p0 = por %p40_p12, %p39_p8  ;;  %p1667_p5 = por %p1899_p3, %p39_p8 }
  0x5a   : > { %s269_s20 = sand.u32 1, %s1455_s26   ;;  %s1069_s21 = sshll.u32 %s1459_s27, 9 }
  0x5b   : > { %s1025_s16 = sshll.u32 %s269_s20, 5  ;;  %s1676_s23 = scalar_lea.hbm %s1881_s0, %s1069_s21 }
  0x5c   : > { %s273_s29 = scalar_lea.vmem [#allocation2], %s1025_s16  ;;  %p1678_p10 = pnand %p1199_p6, %p41_p0 }
  0x5d   : > { %s281_s10 = sshll.u32 %s273_s29, 4  ;;  %s1684_s14 = scalar_lea.sflag [#allocation3], %s269_s20  ;;  %s1682_s10 = int_to_ptr.vmem [resolvable:$true] %s281_s10 }
  0x5e   : > { %s1355_s8 = scalar_lea.hbm %s1676_s23, 512  ;;  %p1357_p9 = pneg %p1678_p10 }
  0x5f   : > { %p1356_p7 = scmp.ne.s32.totalorder %s1676_s23, %s1355_s8  ;;  %s1360_s21 = scalar_lea.hbm %s1881_s0, 2048 }
  0x60   : > { %p1361_p1 = scmp.lt.u32.totalorder %s1676_s23, %s1881_s0  ;;  %p1362_p2 = scmp.lt.u32.totalorder %s1360_s21, %s1355_s8 }
  0x61   : > { %p1358_p11 = pnand %p1357_p9, %p1356_p7  ;;  %p1364_p8 = scmp.lt.u32.totalorder %s1355_s8, %s1676_s23 }
  0x62   : > { %p1363_p4 = por %p1362_p2, %p1361_p1 }
  0x63   : > { %p1359_p13 = pneg %p1358_p11 }
  0x64   : > { %p1365_p12 = por %p1364_p8, %p1363_p4 }
  0x66   : > { %p1366_p6 = pnand %p1365_p12, %p1359_p13 }
  0x68   : > { %1369 = shalt.err (!%p1366_p6)
}
  0x69   : > { %s1370_s20 = scalar_lea.vmem %s1682_s10, 512  ;;  %s1466_s15 = smov [#allocation2]  }
  0x6a   : > { %p1371_p0 = scmp.ne.s32.totalorder %s1682_s10, %s1370_s20  ;;  %s1375_s29 = sshll.u32 %s1466_s15, 4  ;;  %s1376_s29 = int_to_ptr.vmem [resolvable:$false] %s1375_s29 }
  0x6b   : > { %s1377_s12 = scalar_lea.vmem %s1376_s29, 1024  ;;  %p1378_p11 = scmp.lt.s32.totalorder %s1682_s10, %s1376_s29 }
  0x6c   : > { %p1373_p3 = pnand %p1371_p0, %p1357_p9  ;;  %p1379_p1 = scmp.lt.s32.totalorder %s1377_s12, %s1370_s20 }
  0x6e   : > { %p1374_p7 = pneg %p1373_p3  ;;  %p1380_p2 = por %p1379_p1, %p1378_p11 }
  0x70   : > { %p1381_p4 = pnand %p1380_p2, %p1374_p7 }
  0x72   : > { %1384 = shalt.err (!%p1381_p4)
}
  0x73   : > { %s1467_s8 = smov 128   ;;  %s1468_s17 = smov 8  }
  0x74   : > { %1191 = dma.hbm_to_vmem [thread:$0]  (!%p1678_p10), %s1676_s23, 512, %s1682_s10, %s1684_s14, %s1467_s8, %s1467_s8, %s1468_s17  }
  0x75   : > { %p1902_p9 = scmp.ne.s32.totalorder %s1896_s9, 0 }
  0x76   : > { %s1715_s21 = sand.u32 (!%p1902_p9), 1, %s1451_s25   ;;  %p1903_p13 = scmp.ne.s32.totalorder (!%p1902_p9), %s1893_s30, 0 }
  0x77   : > { %293 = sbr.rel (%p1902_p9) target bundleno = 1070 (0x42e), region = 48  ;;  %s1030_s16 = sshll.u32 (!%p1902_p9), %s1715_s21, 5 }
  0x78   : > { %s296_s13 = scalar_lea.sflag (!%p1902_p9), [#allocation3], %s1715_s21  ;;  %s299_s20 = scalar_lea.vmem (!%p1902_p9), [#allocation2], %s1030_s16 }
  0x7e   : > { %1430 = dma.done.wait (%p1903_p13), %s296_s13, 512  }
  0x7f   : > { %1432 = vsyncadd (%p1903_p13), %s296_s13, 4294966784  ;;  %p1904_p10 = scmp.eq.s32.totalorder %s1535_s28, 0 }
  0x81   : > { %1434 = dma.done.wait (%p1904_p10), [#allocation6], 2048   ;;  %p1905_p8 = pmov %p1904_p10 }
  0x83   : > { %1436 = vsyncadd (%p1905_p8), [#allocation6], 4294965248  ;;  %p1906_p12 = pmov %p1905_p8 }
  0x84   : > { %p1907_p6 = pmov %p1905_p8 }
  0x85   : > { %1438 = dma.done.wait (%p1906_p12), [#allocation9], 1024  }
  0x86   : > { %1440 = vsyncadd (%p1907_p6), [#allocation9], 4294966272  ;;  %v349_v0 = vlaneseq  ;;  %v347_v5 = vld [vmem:[%s299_s20 + $0x10] sm:$0xff]  ;;  %v345_v6 = vld [vmem:[%s299_s20] sm:$0xff]  ;;  %s1469_s30 = smov 32   ;;  %s1470_s9 = smov 64  }
  0x87   : > { %457 = vrot.lane.b32.xlu1 %v347_v5, %s1469_s30  ;;  %v413_v8 = vrot.slane %v347_v5, 7  ;;  %v434_v9 = vrot.slane %v347_v5, 1  ;;  %453 = vrot.lane.b32.xlu0 %v345_v6, %s1469_s30  ;;  %v411_v10 = vrot.slane %v345_v6, 7  ;;  %v348_v11 = vld [vmem:[%s299_s20 + $0x18] sm:$0xff]  ;;  %v346_v12 = vld [vmem:[%s299_s20 + $0x8] sm:$0xff]  ;;  %v1247_v13 = vld [vmem:[#allocation5] sm:$0xff]  }
  0x88   : > { %v1733_v1 = vshrl.u32 %v349_v0, 7  ;;  %v432_v14 = vrot.slane %v345_v6, 1  ;;  %v414_v15 = vrot.slane %v348_v11, 7  ;;  %v412_v16 = vrot.slane %v346_v12, 7  ;;  %1102 = vmatprep.subr.bf16.mxu0 %v1247_v13  ;;  %v1248_v21 = vld [vmem:[#allocation5 + $0x8] sm:$0xff]   ;;  %v1249_v26 = vld [vmem:[#allocation5 + $0x10] sm:$0xff]  }
  0x89   : > { %v433_v17 = vrot.slane %v346_v12, 1  ;;  %v435_v18 = vrot.slane %v348_v11, 1  ;;  %1103 = vmatpush3.bf16.msra.mxu0 %v1247_v13  ;;  %v1250_v33 = vld [vmem:[#allocation5 + $0x18] sm:$0xff]   ;;  %v1251_v34 = vld [vmem:[#allocation5 + $0x20] sm:$0xff]   ;;  %v1252_v35 = vld [vmem:[#allocation5 + $0x28] sm:$0xff]   ;;  %s341_s12 = scalar_lea.vmem [#allocation10], %s1030_s16 }
  0x8a   : > { %v351_v2 = vadd.s32 8, %v1733_v1  ;;  %v353_v3 = vadd.s32 24, %v1733_v1  ;;  %vm436_vm0 = vcmp.lt.s32.totalorder %v1733_v1, 7  ;;  %vm415_vm1 = vcmp.lt.s32.totalorder %v1733_v1, 1  ;;  %1104 = vmatprep.subr.bf16.mxu0 %v1248_v21  ;;  %v1253_v36 = vld [vmem:[#allocation5 + $0x30] sm:$0xff]   ;;  %v1254_v37 = vld [vmem:[#allocation5 + $0x38] sm:$0xff]  }
  0x8b   : > { %v438_v20 = vsel %vm436_vm0, %v433_v17, %v434_v9  ;;  %459 = vrot.lane.b32.xlu1 %v348_v11, %s1469_s30  ;;  %455 = vrot.lane.b32.xlu0 %v346_v12, %s1469_s30  ;;  %v417_v22 = vsel %vm415_vm1, %v412_v16, %v413_v8  ;;  %v419_v23 = vsel %vm415_vm1, %v414_v15, %v411_v10  ;;  %v352_v38 = vadd.s32 16, %v1733_v1  ;;  %v1255_v63 = vld [vmem:[#allocation7] sm:$0xff]   ;;  %v1256_v0 = vld [vmem:[#allocation7 + $0x8] sm:$0xff]   ;;  %v1269_v43 = vld [vmem:[#allocation8 + $0x30] sm:$0xff]   ;;  %s917_s8 = sshll.u32 %s341_s12, 4  ;;  %s1071_s17 = sshll.u32 %s1535_s28, 9  ;;  %s1833_s8 = int_to_ptr.vmem [resolvable:$true] %s917_s8 }
  0x8c   : > { %v365_v4 = vand.u32 15, %v351_v2  ;;  %v379_v7 = vand.u32 15, %v353_v3  ;;  %v439_v25 = vsel %vm436_vm0, %v432_v14, %v433_v17  ;;  %v416_v27 = vsel %vm415_vm1, %v413_v8, %v414_v15  ;;  %1122 = vmatprep.subr.bf16.mxu1 %v1255_v63  ;;  %v1257_v2 = vld [vmem:[#allocation7 + $0x10] sm:$0xff]   ;;  %v1258_v3 = vld [vmem:[#allocation7 + $0x18] sm:$0xff]   ;;  %v1260_v5 = vld [vmem:[#allocation7 + $0x28] sm:$0xff]   ;;  %s1838_s16 = scalar_lea.hbm %s1888_s7, %s1071_s17  ;;  %s903_s28 = scalar_lea.sflag [#allocation4], %s1715_s21 }
  0x8d   : > { %v418_v28 = vsel %vm415_vm1, %v411_v10, %v412_v16  ;;  %v440_v30 = vsel %vm436_vm0, %v435_v18, %v432_v14  ;;  %1105 = vmatpush3.bf16.msra.mxu0 %v1248_v21  ;;  %v437_v32 = vsel %vm436_vm0, %v434_v9, %v435_v18  ;;  %v358_v39 = vand.u32 15, %v1733_v1  ;;  %1123 = vmatpush3.bf16.msra.mxu1 %v1255_v63  ;;  %v1035_v6 = vld [vmem:[%s1883_s2] ss:$0 sm:$0xff]  ;;  %v1261_v10 = vld [vmem:[#allocation7 + $0x30] sm:$0xff]   ;;  %v1266_v1 = vld [vmem:[#allocation8 + $0x18] sm:$0xff]  }
  0x8e   : > { %vm1741_vm2 = vcmp.eq.s32.totalorder %v365_v4, 15  ;;  %vm1761_vm3 = vcmp.eq.s32.totalorder %v379_v7, 15  ;;  %1106 = vmatprep.subr.bf16.mxu0 %v1249_v26  ;;  %v372_v42 = vand.u32 15, %v352_v38  ;;  %1124 = vmatprep.subr.bf16.mxu1 %v1256_v0  ;;  %v1259_v4 = vld [vmem:[#allocation7 + $0x20] sm:$0xff]   ;;  %v1268_v19 = vld [vmem:[#allocation8 + $0x28] sm:$0xff]  }
  0x8f   : > { %v450_v24 = vsel %vm1741_vm2, 0.0, %v438_v20  ;;  %465 = vrot.lane.b32.xlu0 %v439_v25, %s1470_s9  ;;  %v452_v31 = vsel %vm1761_vm3, 0.0, %v440_v30  ;;  %vm1777_vm4 = vcmp.eq.s32.totalorder %v358_v39, 0  ;;  %v1262_v20 = vld [vmem:[#allocation7 + $0x38] sm:$0xff]   ;;  %v1263_v38 = vld [vmem:[#allocation8] sm:$0xff]   ;;  %v1264_v39 = vld [vmem:[#allocation8 + $0x8] sm:$0xff]  }
  0x90   : > { %467 = vrot.lane.b32.xlu1 %v450_v24, %s1470_s9  ;;  %v428_v44 = vsel %vm1777_vm4, 0.0, %v419_v23  ;;  %vm1783_vm5 = vcmp.eq.s32.totalorder %v372_v42, 0  ;;  %v1265_v42 = vld [vmem:[#allocation8 + $0x10] sm:$0xff]   ;;  %v1044_v47 = vld [vmem:[%s1885_s4] ss:$0 sm:$0xff] }
  0x91   : > { %1107 = vmatpush3.bf16.msra.mxu0 %v1249_v26  ;;  %v430_v50 = vsel %vm1783_vm5, 0.0, %v417_v22  ;;  %1125 = vmatpush3.bf16.msra.mxu1 %v1256_v0 }
  0x92   : > { %1108 = vmatprep.subr.bf16.mxu0 %v1250_v33  ;;  %1126 = vmatprep.subr.bf16.mxu1 %v1257_v2 }
  0x93   : > { %469 = vrot.lane.b32.xlu0 %v437_v32, %s1470_s9 }
  0x94   : > { %471 = vrot.lane.b32.xlu1 %v452_v31, %s1470_s9 }
  0x95   : > { %1109 = vmatpush3.bf16.msra.mxu0 %v1250_v33  ;;  %1127 = vmatpush3.bf16.msra.mxu1 %v1257_v2 }
  0x96   : > { %1110 = vmatprep.subr.bf16.mxu0 %v1251_v34  ;;  %1128 = vmatprep.subr.bf16.mxu1 %v1258_v3 }
  0x99   : > { %1111 = vmatpush3.bf16.msra.mxu0 %v1251_v34  ;;  %1129 = vmatpush3.bf16.msra.mxu1 %v1258_v3  ;;  %v1270_v3 = vld [vmem:[#allocation8 + $0x38] sm:$0xff]  }
  0x9a   : > { %1112 = vmatprep.subr.bf16.mxu0 %v1252_v35  ;;  %1130 = vmatprep.subr.bf16.mxu1 %v1259_v4 }
  0x9d   : > { %1113 = vmatpush3.bf16.msra.mxu0 %v1252_v35  ;;  %1131 = vmatpush3.bf16.msra.mxu1 %v1259_v4 }
  0x9e   : > { %1114 = vmatprep.subr.bf16.mxu0 %v1253_v36  ;;  %1132 = vmatprep.subr.bf16.mxu1 %v1260_v5 }
  0xa1   : > { %1115 = vmatpush3.bf16.msra.mxu0 %v1253_v36  ;;  %1133 = vmatpush3.bf16.msra.mxu1 %v1260_v5 }
  0xa2   : > { %1116 = vmatprep.subr.bf16.mxu0 %v1254_v37  ;;  %1134 = vmatprep.subr.bf16.mxu1 %v1261_v10 }
  0xa5   : > { %1117 = vmatpush3.bf16.msra.mxu0 %v1254_v37  ;;  %1135 = vmatpush3.bf16.msra.mxu1 %v1261_v10 }
  0xa6   : > { %1136 = vmatprep.subr.bf16.mxu1 %v1262_v20  ;;  %1142 = vmatprep.subr.bf16.mxu0 %v1263_v38 }
  0xa9   : > { %1137 = vmatpush3.bf16.msra.mxu1 %v1262_v20 }
  0xf9   : > { %v458_v40 = vpop.permute.xlu1 %457  ;;  %v454_v41 = vpop.permute.xlu0 %453 }
  0xfa   : > { %v461_v48 = vadd.f32 %v454_v41, %v428_v44  ;;  %v463_v55 = vadd.f32 %v458_v40, %v430_v50 }
  0xfd   : > { %v460_v45 = vpop.permute.xlu1 %459  ;;  %v456_v46 = vpop.permute.xlu0 %455 }
  0xfe   : > { %v462_v49 = vadd.f32 %v456_v46, %v418_v28  ;;  %v464_v56 = vadd.f32 %v460_v45, %v416_v27  ;;  %v1267_v45 = vld [vmem:[#allocation8 + $0x20] sm:$0xff]  }
 0x101   : > { %v466_v52 = vpop.permute.xlu0 %465 }
 0x102   : > { %v468_v51 = vpop.permute.xlu1 %467  ;;  %v473_v54 = vadd.f32 %v466_v52, %v461_v48 }
 0x103   : > { %v474_v53 = vadd.f32 %v468_v51, %v462_v49 }
 0x105   : > { %v477_v57 = vpack.c.bf16 %v474_v53, %v473_v54  ;;  %v470_v59 = vpop.permute.xlu0 %469 }
 0x106   : > { %v472_v58 = vpop.permute.xlu1 %471  ;;  %v475_v61 = vadd.f32 %v470_v59, %v463_v55 }
 0x107   : > { %v476_v60 = vadd.f32 %v472_v58, %v464_v56  ;;  %1118 = vmatprep.mubr.bf16.mxu0 %v477_v57 }
 0x109   : > { %v478_v62 = vpack.c.bf16 %v476_v60, %v475_v61 }
 0x10b   : > { %1119 = vmatmul.mubr.bf16.vlgmr.msra.gmra.mrb[0].mxu0 %v478_v62 }
 0x10c   : > { %1143 = vmatpush3.bf16.msra.mxu0 %v1263_v38 }
 0x10d   : > { %1144 = vmatprep.subr.bf16.mxu0 %v1264_v39 }
 0x110   : > { %1145 = vmatpush3.bf16.msra.mxu0 %v1264_v39 }
 0x111   : > { %1146 = vmatprep.subr.bf16.mxu0 %v1265_v42 }
 0x114   : > { %1147 = vmatpush3.bf16.msra.mxu0 %v1265_v42 }
 0x115   : > { %1148 = vmatprep.subr.bf16.mxu0 %v1266_v1 }
 0x118   : > { %1149 = vmatpush3.bf16.msra.mxu0 %v1266_v1 }
 0x119   : > { %1150 = vmatprep.subr.bf16.mxu0 %v1267_v45 }
 0x11c   : > { %1151 = vmatpush3.bf16.msra.mxu0 %v1267_v45 }
 0x11d   : > { %1152 = vmatprep.subr.bf16.mxu0 %v1268_v19 }
 0x120   : > { %1153 = vmatpush3.bf16.msra.mxu0 %v1268_v19 }
 0x121   : > { %1154 = vmatprep.subr.bf16.mxu0 %v1269_v43 }
 0x124   : > { %1155 = vmatpush3.bf16.msra.mxu0 %v1269_v43 }
 0x125   : > { %1156 = vmatprep.subr.bf16.mxu0 %v1270_v3 }
 0x128   : > { %1157 = vmatpush3.bf16.msra.mxu0 %v1270_v3 }
 0x1de   : > { %v1120_v7 = vpop.f32.mrb[0].mxu0 }
 0x1df   : > { %v592_v8 = vadd.f32 %v1120_v7, %v1035_v6  ;;  %v583_v9 = vpop.f32.mrb[1].mxu0 }
 0x1e0   : > { %v584_v11 = vadd.f32 %v1035_v6, %v583_v9  ;;  %v1121_v12 = vpop.f32.mrb[2].mxu0 }
 0x1e1   : > { %v600_v13 = vmax.f32 %v592_v8, 0.0  ;;  %v595_v14 = vadd.f32 %v1121_v12, %v1035_v6  ;;  %v586_v15 = vpop.f32.mrb[3].mxu0 }
 0x1e2   : > { %v598_v16 = vmax.f32 %v584_v11, 0.0  ;;  %v587_v17 = vadd.f32 %v1035_v6, %v586_v15 }
 0x1e3   : > { %v601_v18 = vmax.f32 %v595_v14, 0.0  ;;  %631 = vrot.lane.b32.xlu0 %v600_v13, %s1469_s30  ;;  %v605_v24 = vrot.slane %v600_v13, 7  ;;  %v617_v25 = vrot.slane %v600_v13, 1 }
 0x1e4   : > { %v603_v21 = vrot.slane %v598_v16, 7  ;;  %v615_v22 = vrot.slane %v598_v16, 1  ;;  %v599_v23 = vmax.f32 %v587_v17, 0.0 }
 0x1e5   : > { %v606_v26 = vrot.slane %v601_v18, 7  ;;  %v618_v27 = vrot.slane %v601_v18, 1  ;;  %633 = vrot.lane.b32.xlu1 %v601_v18, %s1469_s30  ;;  %v1053_v18 = vld [vmem:[%s1887_s6] ss:$0 sm:$0xff] }
 0x1e6   : > { %v604_v28 = vrot.slane %v599_v23, 7  ;;  %v616_v30 = vrot.slane %v599_v23, 1 }
 0x1e7   : > { %627 = vrot.lane.b32.xlu0 %v598_v16, %s1469_s30  ;;  %v619_v31 = vsel %vm436_vm0, %v617_v25, %v618_v27  ;;  %v622_v32 = vsel %vm436_vm0, %v618_v27, %v615_v22  ;;  %v607_v33 = vsel %vm415_vm1, %v605_v24, %v606_v26  ;;  %v610_v34 = vsel %vm415_vm1, %v606_v26, %v603_v21 }
 0x1e8   : > { %v621_v35 = vsel %vm436_vm0, %v615_v22, %v616_v30  ;;  %v620_v36 = vsel %vm436_vm0, %v616_v30, %v617_v25  ;;  %v608_v37 = vsel %vm415_vm1, %v604_v28, %v605_v24  ;;  %v609_v40 = vsel %vm415_vm1, %v603_v21, %v604_v28 }
 0x1e9   : > { %629 = vrot.lane.b32.xlu1 %v599_v23, %s1469_s30  ;;  %v624_v41 = vsel %vm1741_vm2, 0.0, %v620_v36  ;;  %v626_v44 = vsel %vm1761_vm3, 0.0, %v622_v32  ;;  %v611_v29 = vsel %vm1777_vm4, 0.0, %v610_v34  ;;  %v613_v57 = vsel %vm1783_vm5, 0.0, %v608_v37  ;;  %s1385_s30 = scalar_lea.vmem %s1833_s8, 512 }
 0x1ea   : > { %p1386_p0 = scmp.ne.s32.totalorder %s1833_s8, %s1385_s30 }
 0x1eb   : > { %639 = vrot.lane.b32.xlu0 %v621_v35, %s1470_s9 }
 0x1ec   : > { %p1387_p3 = pnand %p1386_p0, %p1667_p5 }
 0x1ed   : > { %641 = vrot.lane.b32.xlu1 %v624_v41, %s1470_s9 }
 0x1ee   : > { %p1388_p7 = pneg %p1387_p3 }
 0x1ef   : > { %643 = vrot.lane.b32.xlu0 %v619_v31, %s1470_s9 }
 0x1f1   : > { %645 = vrot.lane.b32.xlu1 %v626_v44, %s1470_s9  ;;  %s1471_s9 = smov [#allocation10]  }
 0x1f2   : > { %s1389_s23 = sshll.u32 %s1471_s9, 4  ;;  %s1390_s23 = int_to_ptr.vmem [resolvable:$false] %s1389_s23 }
 0x1f3   : > { %s1391_s10 = scalar_lea.vmem %s1390_s23, 1024  ;;  %p1392_p11 = scmp.lt.s32.totalorder %s1833_s8, %s1390_s23 }
 0x1f4   : > { %p1393_p1 = scmp.lt.s32.totalorder %s1391_s10, %s1385_s30 }
 0x1f6   : > { %p1394_p2 = por %p1393_p1, %p1392_p11 }
 0x1f8   : > { %p1395_p4 = pnand %p1394_p2, %p1388_p7 }
 0x255   : > { %v632_v46 = vpop.permute.xlu0 %631 }
 0x256   : > { %v637_v59 = vadd.f32 %v632_v46, %v613_v57 }
 0x257   : > { %v634_v48 = vpop.permute.xlu1 %633 }
 0x258   : > { %v638_v60 = vadd.f32 %v634_v48, %v607_v33 }
 0x259   : > { %v628_v49 = vpop.permute.xlu0 %627 }
 0x25a   : > { %v635_v52 = vadd.f32 %v628_v49, %v611_v29 }
 0x25b   : > { %v630_v50 = vpop.permute.xlu1 %629 }
 0x25c   : > { %v636_v53 = vadd.f32 %v630_v50, %v609_v40 }
 0x25d   : > { %v640_v51 = vpop.permute.xlu0 %639 }
 0x25e   : > { %v647_v55 = vadd.f32 %v640_v51, %v635_v52 }
 0x25f   : > { %v642_v54 = vpop.permute.xlu1 %641 }
 0x260   : > { %v648_v56 = vadd.f32 %v642_v54, %v636_v53 }
 0x261   : > { %v644_v58 = vpop.permute.xlu0 %643 }
 0x262   : > { %v651_v61 = vpack.c.bf16 %v648_v56, %v647_v55  ;;  %v649_v63 = vadd.f32 %v644_v58, %v637_v59 }
 0x263   : > { %v646_v62 = vpop.permute.xlu1 %645 }
 0x264   : > { %v650_v0 = vadd.f32 %v646_v62, %v638_v60  ;;  %1138 = vmatprep.mubr.bf16.mxu1 %v651_v61 }
 0x266   : > { %v652_v2 = vpack.c.bf16 %v650_v0, %v649_v63 }
 0x268   : > { %1139 = vmatmul.mubr.bf16.vlgmr.msra.gmra.mrb[0].mxu1 %v652_v2 }
 0x33b   : > { %v1140_v4 = vpop.f32.mrb[0].mxu1 }
 0x33c   : > { %v766_v5 = vadd.f32 %v1140_v4, %v1044_v47  ;;  %v757_v6 = vpop.f32.mrb[1].mxu1 }
 0x33d   : > { %v758_v7 = vadd.f32 %v1044_v47, %v757_v6  ;;  %v1141_v8 = vpop.f32.mrb[2].mxu1 }
 0x33e   : > { %v769_v9 = vadd.f32 %v1141_v8, %v1044_v47  ;;  %v760_v10 = vpop.f32.mrb[3].mxu1  ;;  %v774_v12 = vmax.f32 %v766_v5, 0.0 }
 0x33f   : > { %v761_v11 = vadd.f32 %v1044_v47, %v760_v10  ;;  %v772_v14 = vmax.f32 %v758_v7, 0.0 }
 0x340   : > { %v775_v13 = vmax.f32 %v769_v9, 0.0 }
 0x341   : > { %v773_v15 = vmax.f32 %v761_v11, 0.0 }
 0x342   : > { %v794_v16 = vpack.c.bf16 %v775_v13, %v774_v12 }
 0x343   : > { %v793_v17 = vpack.c.bf16 %v773_v15, %v772_v14 }
 0x345   : > { %1158 = vmatprep.mubr.bf16.mxu0 %v793_v17 }
 0x346   : > { %1159 = vmatmul.mubr.bf16.vlgmr.msra.gmra.mrb[4].mxu0 %v794_v16 }
 0x419   : > { %v1160_v20 = vpop.f32.mrb[4].mxu0 }
 0x41a   : > { %v892_v21 = vadd.f32 %v1160_v20, %v1053_v18  ;;  %v883_v22 = vpop.f32.mrb[5].mxu0 }
 0x41b   : > { %v884_v23 = vadd.f32 %v1053_v18, %v883_v22  ;;  %v1161_v24 = vpop.f32.mrb[6].mxu0 }
 0x41c   : > { %900 = vst [vmem:[%s341_s12 + $0x10] sm:$0xff] %v892_v21  ;;  %v895_v25 = vadd.f32 %v1161_v24, %v1053_v18  ;;  %v886_v26 = vpop.f32.mrb[7].mxu0 }
 0x41d   : > { %898 = vst [vmem:[%s341_s12] sm:$0xff] %v884_v23  ;;  %v887_v27 = vadd.f32 %v1053_v18, %v886_v26 }
 0x41e   : > { %901 = vst [vmem:[%s341_s12 + $0x18] sm:$0xff] %v895_v25 }
 0x41f   : > { %899 = vst [vmem:[%s341_s12 + $0x8] sm:$0xff] %v887_v27 }
 0x420   : > { %1398 = shalt.err (!%p1395_p4)
}
 0x421   : > { %s1399_s11 = scalar_lea.hbm %s1838_s16, 512  ;;  %s1403_s29 = scalar_lea.hbm %s1888_s7, 2048 }
 0x422   : > { %p1400_p9 = scmp.ne.s32.totalorder %s1838_s16, %s1399_s11  ;;  %p1404_p8 = scmp.lt.u32.totalorder %s1838_s16, %s1888_s7 }
 0x423   : > { %p1405_p12 = scmp.lt.u32.totalorder %s1403_s29, %s1399_s11  ;;  %p1407_p0 = scmp.lt.u32.totalorder %s1399_s11, %s1838_s16 }
 0x424   : > { %p1401_p13 = pnand %p1400_p9, %p1667_p5 }
 0x425   : > { %p1406_p6 = por %p1405_p12, %p1404_p8 }
 0x426   : > { %p1402_p10 = pneg %p1401_p13 }
 0x427   : > { %p1408_p3 = por %p1407_p0, %p1406_p6 }
 0x429   : > { %p1409_p7 = pnand %p1408_p3, %p1402_p10 }
 0x42b   : > { %1412 = shalt.err (!%p1409_p7)
}
 0x42c   : > { %s1472_s13 = smov 128   ;;  %s1473_s20 = smov 8  }
 0x42d   : > { %1176 = dma.vmem_to_hbm [thread:$0]  (%p1667_p5), %s1833_s8, 512, %s1838_s16, %s903_s28, %s1472_s13, %s1472_s13, %s1473_s20  }
 0x42e PF: > { %s1916_s30 = sld [smem:[#allocation15_spill]]  ;;  %p1203_p11 = scmp.ge.s32.totalorder %s1459_s27, 2 }
 0x42f   : > { %s932_s9 = sand.u32 1, %s1447_s24  }
 0x430   : > { %s933_s23 = scalar_lea.sflag [#allocation4], %s932_s9 }
 0x434   : > { %p1917_p1 = scmp.ne.s32.totalorder %s1916_s30, 0 }
 0x436   : > { %p1193_p2 = pnand %p1203_p11, %p1917_p1 }
 0x438   : > { %1442 = dma.done.wait (!%p1193_p2), %s933_s23, 512  }
 0x439   : > { %1444 = vsyncadd (!%p1193_p2), %s933_s23, 4294966784  ;;  %p22_p4 = scmp.ge.s32.totalorder %s1653_s22, 6   ;;  %s1918_s24 = smov %s1451_s25 }
 0x43a   : > { %s1919_s25 = smov %s1455_s26  ;;  %s1920_s26 = smov %s1663_s18 }
 0x43b   : > { %s1921_s27 = smov %s1653_s22  ;;  %24 = sbr.rel (!%p22_p4) target bundleno = 7 (0x7), region = 105 }
 0x442   :  { %938 = vsyncpa [#allocation3], 1 }
 0x443   :  { %940 = vsyncpa [#allocation3 + $0x1], 1 }
 0x444   :  { %941 = vsyncpa [#allocation6], 1 }
 0x445   :  { %942 = vsyncpa [#allocation9], 1 }
 0x446   :  { %943 = vsyncpa [#allocation4], 1 }
 0x447   :  { %945 = vsyncpa [#allocation4 + $0x1], 1 }

</bundles_post_ra>
